<compile_context>
chip_gen: v5e
topology: v5e:2x2
jax: 0.10.0
libtpu: 0.0.40
codegen_flags: <defaults>
</compile_context>

<pallas_src>
import functools
import math

import jax
import jax.numpy as jnp
import numpy as np
from jax.experimental import pallas as pl
from jax.experimental.pallas import tpu as pltpu

EPSILON = 1e-15
LANE = 128      # TPU lane width; N tiles are multiples of this (lane-dense).
SUBLANE = 8     # TPU sublane width; K is padded to this.


def _round_up(x, m):
    return ((x + m - 1) // m) * m


def gmm_ll_kernel(xt_ref, w_ref, const_ref, o_ref, *, dims):
    """One N-tile of Gaussian log-likelihoods (N on the lane axis).

    xt_ref:    (D, TN)        sample tile, transposed (lane-dense)
    w_ref:     (K_sub, F)     fused quadratic+linear weights, F = D*D + D
    const_ref: (K_sub, 1)     per-component constant
    o_ref:     (K_sub, TN)    output log-likelihood tile
    """
    xt = xt_ref[...]                                      # (D, TN) f32
    # Lane-dense feature map (VPU only, tile-aligned sublane concat):
    #   feats[d*D + e, n] = x[n, d] * x[n, e]
    #   feats[D*D + e, n] = x[n, e]
    parts = [xt * xt[d:d + 1, :] for d in range(dims)]    # each (D, TN)
    parts.append(xt)
    feats = jnp.concatenate(parts, axis=0)                # (D*D + D, TN)
    # Single MXU matmul; output is lane-dense (TN lanes), K in sublanes.
    o_ref[...] = const_ref[...] + jnp.dot(
        w_ref[...], feats, preferred_element_type=jnp.float32)


def gmm_forward(x, w_t, const, count, *, block_n=2048, min_grid_steps=4):
    """Pallas wrapper.

    x:     (N, D) samples
    w_t:   (K_sub, D*D + D) fused weights (K padded to a sublane multiple)
    const: (K_sub, 1) per-component constants
    returns (N, count) log-likelihoods (same layout as the torch module).
    """
    N, D = x.shape
    K_sub, F = w_t.shape
    assert F == D * D + D
    assert K_sub % SUBLANE == 0 and count <= K_sub

    # N tile: multiple of 128 (lane-dense loads/stores), at most block_n, and
    # small enough that the grid has >= min_grid_steps steps when N allows,
    # so the "parallel" axis shards across both TensorCores on v7x.
    block_n = _round_up(block_n, LANE)
    tn = min(block_n, _round_up(pl.cdiv(N, min_grid_steps), LANE))
    n_pad = _round_up(N, tn)

    # Transpose once in the wrapper so the kernel sees lane-dense (D, TN)
    # tiles (D=8 f32 per sample read + 8 f32 per sample written -- the
    # lane-padded (N, 128) writeback of the previous version is gone).
    xt = x.T                                              # (D, N)
    if n_pad != N:
        xt = jnp.pad(xt, ((0, 0), (0, n_pad - N)))
    grid = (n_pad // tn,)

    cost = pl.CostEstimate(
        flops=2 * n_pad * K_sub * F + 2 * n_pad * D * D,
        transcendentals=0,
        bytes_accessed=4 * (n_pad * D + K_sub * F + K_sub + K_sub * n_pad),
    )

    out = pl.pallas_call(
        functools.partial(gmm_ll_kernel, dims=D),
        out_shape=jax.ShapeDtypeStruct((K_sub, n_pad), jnp.float32),
        grid_spec=pl.GridSpec(
            grid=grid,
            in_specs=[
                pl.BlockSpec((D, tn), lambda i: (0, i)),       # tiled samples
                pl.BlockSpec((K_sub, F), lambda i: (0, 0)),    # VMEM-resident
                pl.BlockSpec((K_sub, 1), lambda i: (0, 0)),    # VMEM-resident
            ],
            out_specs=pl.BlockSpec((K_sub, tn), lambda i: (0, i)),
        ),
        compiler_params=pltpu.CompilerParams(
            dimension_semantics=("parallel",)),  # shard N across TCs on v7x
        cost_estimate=cost,
    )(xt, w_t, const)
    # Tiny row slice (count rows) + transpose back to the module's (N, K).
    return out[:count, :N].T


def build_gmm_params(key, count, dims):
    """Deterministically initialize GMM parameters (mirrors the torch __init__)."""
    k_phi, k_mu, k_eps = jax.random.split(key, 3)
    # GMM.__init__: phi ~ Dirichlet([1/count]*count)
    concentration = jnp.full((count,), 1.0 / count, dtype=jnp.float32)
    phi = jax.random.dirichlet(k_phi, concentration).astype(jnp.float32)  # (K,)
    # Gaussian.__init__: mu = (rand(dims) - 0.5) * 2, sigma = eye(dims)
    mu = (jax.random.uniform(k_mu, (count, dims), dtype=jnp.float32) - 0.5) * 2.0
    sigma = jnp.broadcast_to(jnp.eye(dims, dtype=jnp.float32),
                             (count, dims, dims))
    # TODO(synk): torch draws a fresh random epsilon jitter on every forward
    # call; here it is fixed once at setup for determinism.
    eps = (jax.random.uniform(k_eps, (count, dims, dims),
                              dtype=jnp.float32) - 0.5) * EPSILON
    sigma = sigma + eps
    return phi, mu, sigma


def precompute_glue(phi, mu, sigma):
    """Plain-JAX parameter glue: pinverse, logdet, fused-weight packing.

    Returns (transposed layout -- K in sublanes):
      w_t:   (K_sub, D*D + D)  w_t[k, d*D+e] = -0.5 * A_k[d, e]
                               w_t[k, D*D+e] = 0.5 * ((A_k + A_k^T) @ mu_k)[e]
      const: (K_sub, 1)        log(phi_k) - 0.5*(D*log(2*pi) + logdet(sigma_k))
                               - 0.5 * mu_k^T A_k mu_k
    """
    K, D = mu.shape
    inv_sigma = jax.vmap(jnp.linalg.pinv)(sigma).astype(jnp.float32)   # (K,D,D)
    _, logdet = jnp.linalg.slogdet(sigma)                              # (K,)
    log_two_pi_dims = D * (math.log(2.0) + math.log(math.pi))
    log_sqrt_den = 0.5 * (log_two_pi_dims + logdet)                    # (K,)
    quad_mu = jnp.einsum('kd,kde,ke->k', mu, inv_sigma, mu)            # mu^T A mu
    const = jnp.log(phi) - log_sqrt_den - 0.5 * quad_mu                # (K,)

    w_quad = -0.5 * inv_sigma.reshape(K, D * D)                        # (K, D*D)
    w_lin = 0.5 * (jnp.einsum('ked,kd->ke', inv_sigma, mu) +
                   jnp.einsum('kde,kd->ke', inv_sigma, mu))            # (K, D)
    w = jnp.concatenate([w_quad, w_lin], axis=1)                       # (K, F)

    k_sub = _round_up(K, SUBLANE)
    w_pad = jnp.zeros((k_sub, D * D + D), jnp.float32).at[:K, :].set(w)
    const_pad = jnp.zeros((k_sub, 1), jnp.float32).at[:K, 0].set(
        const.astype(jnp.float32))
    return w_pad, const_pad


def gmm_forward_reference(x, phi, mu, sigma):
    """Pure-JAX reference of the original (diff-based) math, for checking."""
    K, D = mu.shape
    inv_sigma = jax.vmap(jnp.linalg.pinv)(sigma)
    _, logdet = jnp.linalg.slogdet(sigma)
    log_two_pi_dims = D * (math.log(2.0) + math.log(math.pi))
    log_sqrt_den = 0.5 * (log_two_pi_dims + logdet)                    # (K,)
    diff = x[:, None, :] - mu[None, :, :]                              # (N,K,D)
    q = jnp.einsum('nkd,kde,nke->nk', diff, inv_sigma, diff)           # (N,K)
    return jnp.log(phi)[None, :] - 0.5 * q - log_sqrt_den[None, :]


if __name__ == "__main__":
    COUNT = 4     # number of mixture components
    DIMS = 8      # feature dimension
    N = 1024      # number of samples (exercises several N-tiles / both TCs)

    key = jax.random.PRNGKey(0)
    k_params, k_x = jax.random.split(key)

    phi, mu, sigma = build_gmm_params(k_params, COUNT, DIMS)
    w_t, const = precompute_glue(phi, mu, sigma)

    x = jax.random.normal(k_x, (N, DIMS), dtype=jnp.float32)

    fwd = jax.jit(gmm_forward,
                  static_argnames=("count", "block_n", "min_grid_steps"))
    out = fwd(x, w_t, const, count=COUNT)
    out = jax.block_until_ready(out)

    ref = gmm_forward_reference(x, phi, mu, sigma)
    assert out.shape == (N, COUNT), out.shape
    err = np.max(np.abs(np.asarray(out) - np.asarray(ref)))
    assert np.allclose(np.asarray(out), np.asarray(ref),
                       rtol=1e-5, atol=1e-4), f"max abs err {err}"

    print("KERNEL_OK")
</pallas_src>

<mosaic_0001>
module attributes {stable_mosaic.version = 11 : i64} {
  func.func @gmm_ll_kernel(%arg0: i32, %arg1: memref<8x256xf32, #tpu.memory_space<vmem>>, %arg2: memref<8x72xf32, #tpu.memory_space<vmem>>, %arg3: memref<8x1xf32, #tpu.memory_space<vmem>>, %arg4: memref<8x256xf32, #tpu.memory_space<vmem>>) attributes {dimension_semantics = [#tpu.dimension_semantics<parallel>], iteration_bounds = array<i64: 4>, scalar_prefetch = 0 : i64, scratch_operands = 0 : i64, tpu.core_type = #tpu.core_type<tc>, window_params = [{transform_indices = @transform_0, window_bounds = array<i64: 8, 256>}, {pipeline_mode = #tpu.pipeline_mode<synchronous>, transform_indices = @transform_1, window_bounds = array<i64: 8, 72>}, {pipeline_mode = #tpu.pipeline_mode<synchronous>, transform_indices = @transform_2, window_bounds = array<i64: 8, 1>}, {transform_indices = @transform_3, window_bounds = array<i64: 8, 256>}]} {
    %c0 = arith.constant 0 : index
    %c0_0 = arith.constant 0 : index
    %0 = vector.load %arg1[%c0, %c0_0] : memref<8x256xf32, #tpu.memory_space<vmem>>, vector<8x256xf32>
    %1 = vector.extract_strided_slice %0 {offsets = [0, 0], sizes = [1, 256], strides = [1, 1]} : vector<8x256xf32> to vector<1x256xf32>
    %2 = vector.broadcast %1 : vector<1x256xf32> to vector<8x256xf32>
    %3 = arith.mulf %0, %2 : vector<8x256xf32>
    %4 = vector.extract_strided_slice %0 {offsets = [1, 0], sizes = [1, 256], strides = [1, 1]} : vector<8x256xf32> to vector<1x256xf32>
    %5 = vector.broadcast %4 : vector<1x256xf32> to vector<8x256xf32>
    %6 = arith.mulf %0, %5 : vector<8x256xf32>
    %7 = vector.extract_strided_slice %0 {offsets = [2, 0], sizes = [1, 256], strides = [1, 1]} : vector<8x256xf32> to vector<1x256xf32>
    %8 = vector.broadcast %7 : vector<1x256xf32> to vector<8x256xf32>
    %9 = arith.mulf %0, %8 : vector<8x256xf32>
    %10 = vector.extract_strided_slice %0 {offsets = [3, 0], sizes = [1, 256], strides = [1, 1]} : vector<8x256xf32> to vector<1x256xf32>
    %11 = vector.broadcast %10 : vector<1x256xf32> to vector<8x256xf32>
    %12 = arith.mulf %0, %11 : vector<8x256xf32>
    %13 = vector.extract_strided_slice %0 {offsets = [4, 0], sizes = [1, 256], strides = [1, 1]} : vector<8x256xf32> to vector<1x256xf32>
    %14 = vector.broadcast %13 : vector<1x256xf32> to vector<8x256xf32>
    %15 = arith.mulf %0, %14 : vector<8x256xf32>
    %16 = vector.extract_strided_slice %0 {offsets = [5, 0], sizes = [1, 256], strides = [1, 1]} : vector<8x256xf32> to vector<1x256xf32>
    %17 = vector.broadcast %16 : vector<1x256xf32> to vector<8x256xf32>
    %18 = arith.mulf %0, %17 : vector<8x256xf32>
    %19 = vector.extract_strided_slice %0 {offsets = [6, 0], sizes = [1, 256], strides = [1, 1]} : vector<8x256xf32> to vector<1x256xf32>
    %20 = vector.broadcast %19 : vector<1x256xf32> to vector<8x256xf32>
    %21 = arith.mulf %0, %20 : vector<8x256xf32>
    %22 = vector.extract_strided_slice %0 {offsets = [7, 0], sizes = [1, 256], strides = [1, 1]} : vector<8x256xf32> to vector<1x256xf32>
    %23 = vector.broadcast %22 : vector<1x256xf32> to vector<8x256xf32>
    %24 = arith.mulf %0, %23 : vector<8x256xf32>
    %25 = tpu.concatenate %3, %6, %9, %12, %15, %18, %21, %24, %0 in 0 : vector<8x256xf32>, vector<8x256xf32>, vector<8x256xf32>, vector<8x256xf32>, vector<8x256xf32>, vector<8x256xf32>, vector<8x256xf32>, vector<8x256xf32>, vector<8x256xf32> -> vector<72x256xf32>
    %c0_1 = arith.constant 0 : index
    %c0_2 = arith.constant 0 : index
    %26 = vector.load %arg3[%c0_1, %c0_2] : memref<8x1xf32, #tpu.memory_space<vmem>>, vector<8x1xf32>
    %c0_3 = arith.constant 0 : index
    %c0_4 = arith.constant 0 : index
    %27 = vector.load %arg2[%c0_3, %c0_4] : memref<8x72xf32, #tpu.memory_space<vmem>>, vector<8x72xf32>
    %cst = arith.constant dense<0.000000e+00> : vector<8x256xf32>
    %28 = tpu.matmul %27, %25, %cst {dimension_numbers = #tpu.dot_dimension_numbers<[1], [0], [0], [1], [0, 0, 1, 1], [], []>} : vector<8x72xf32>, vector<72x256xf32>, vector<8x256xf32> -> vector<8x256xf32>
    %29 = vector.broadcast %26 : vector<8x1xf32> to vector<8x256xf32>
    %30 = arith.addf %29, %28 : vector<8x256xf32>
    %c0_5 = arith.constant 0 : index
    %c0_6 = arith.constant 0 : index
    %31 = vector.load %arg4[%c0_5, %c0_6] : memref<8x256xf32, #tpu.memory_space<vmem>>, vector<8x256xf32>
    tpu.vector_store %arg4[%c0_5, %c0_6], %30 {strides = array<i32>} : memref<8x256xf32, #tpu.memory_space<vmem>>, vector<8x256xf32>,
    return
  }
  func.func @transform_0(%arg0: i32) -> (i32, i32) {
    %c0_i32 = arith.constant 0 : i32
    %c0_i32_0 = arith.constant 0 : i32
    return %c0_i32, %arg0 : i32, i32
  }
  func.func @transform_1(%arg0: i32) -> (i32, i32) {
    %c0_i32 = arith.constant 0 : i32
    %c0_i32_0 = arith.constant 0 : i32
    %c0_i32_1 = arith.constant 0 : i32
    return %c0_i32, %c0_i32_0 : i32, i32
  }
  func.func @transform_2(%arg0: i32) -> (i32, i32) {
    %c0_i32 = arith.constant 0 : i32
    %c0_i32_0 = arith.constant 0 : i32
    %c0_i32_1 = arith.constant 0 : i32
    return %c0_i32, %c0_i32_0 : i32, i32
  }
  func.func @transform_3(%arg0: i32) -> (i32, i32) {
    %c0_i32 = arith.constant 0 : i32
    %c0_i32_0 = arith.constant 0 : i32
    return %c0_i32, %arg0 : i32, i32
  }
}

</mosaic_0001>

<bundles_post_ra>
// kernel: gmm_forward.1
= control target key start
LH: loop header
LB: loop body
LE: loop exit
PB: predicated region body
PF: predicated region fallthrough
CT: control target
= control target key end

     0   :  { %8 = vsyncpa [#allocation3], 0  ;;  %s592_s0 = inlined_call_operand.hbm [shape: f32[8,1024], index: 0, kind: input, shape index: {}]   ;;  %s593_s1 = inlined_call_operand.vmem [shape: f32[8,72], index: 1, kind: input, shape index: {}]   ;;  %s594_s2 = inlined_call_operand.vmem [shape: f32[8,1], index: 2, kind: input, shape index: {}]   ;;  %s595_s3 = inlined_call_operand.vmem [shape: f32[8,1024], index: 3, kind: output, shape index: {}]  }
   0x1   :  { %10 = vsyncpa [#allocation3 + $0x1], 0  ;;  %s493_s12 = smov 0   ;;  %s495_s13 = smov 0  }
   0x2   :  { %s497_s14 = smov 0   ;;  %s499_s15 = smov 0  }
   0x3 LB: > { %s349_s16 = sadd.s32 4294967295, %s470_s15   ;;  %s513_s17 = sadd.s32 1, %s470_s15   ;;  %s470_s15 = sphi %s499_s15, %s602_s15   ;;  %s466_s14 = sphi %s497_s14, %s601_s14   ;;  %s462_s13 = sphi %s495_s13, %s600_s13   ;;  %s458_s12 = sphi %s493_s12, %s599_s12  }
   0x4   : > { %s20_s18 = ssub.s32 %s470_s15, %s513_s17  ;;  %s23_s19 = sadd.s32 1, %s466_s14 }
   0x5   : > { %p21_p0 = scmp.eq.s32.totalorder %s20_s18, 0  ;;  %p30_p1 = scmp.ne.s32.totalorder %s466_s14, %s462_s13 }
   0x6   : > { %p31_p2 = scmp.eq.s32.totalorder %s470_s15, 0  ;;  %p36_p3 = scmp.ne.s32.totalorder %s462_s13, %s458_s12 }
   0x7   : > { %s523_s20 = scalar_select %p21_p0, %s466_s14, %s23_s19  }
   0x8   : > { %p525_p4 = por %p31_p2, %p30_p1  ;;  %p37_p5 = scmp.eq.s32.totalorder %s349_s16, 0 }
   0x9   : > { %p371_p6 = scmp.lt.s32.totalorder %s470_s15, 4  ;;  %s134_s23 = sand.u32 1, %s466_s14  }
   0xa   : > { %p532_p7 = por %p37_p5, %p36_p3  ;;  %s353_s24 = sshll.u32 %s134_s23, 4 }
   0xb   : > { %s364_s25 = sshll.u32 %s470_s15, 4  ;;  %s138_s29 = scalar_lea.vmem [#allocation2], %s353_s24 }
   0xc   : > { %s143_s28 = scalar_lea.hbm %s592_s0, %s364_s25  ;;  %s147_s30 = sshll.u32 %s138_s29, 4  ;;  %s148_s30 = int_to_ptr.vmem [resolvable:$true] %s147_s30 }
   0xd   : > { %s145_s4 = sshll.u32 %s143_s28, 4  ;;  %p543_p8 = pnand %p371_p6, %p525_p4  ;;  %s146_s4 = int_to_ptr.hbm [resolvable:$true] %s145_s4 }
   0xe   : > { %p356_p9 = scmp.ge.s32.totalorder %s470_s15, 1  ;;  %p152_p10 = scmp.lt.s32.totalorder %s470_s15, 5 }
   0xf   : > { %s135_s6 = scalar_lea.sflag [#allocation3], %s134_s23  ;;  %s406_s7 = sshra.s32 %s146_s4, 4  ;;  %s407_s7 = int_to_ptr.hbm [resolvable:$true] %s406_s7 }
  0x10   : > { %s408_s8 = scalar_lea.hbm %s407_s7, 16  ;;  %p410_p12 = pneg %p543_p8 }
  0x11   : > { %p409_p11 = scmp.ne.s32.totalorder %s407_s7, %s408_s8  ;;  %s413_s11 = scalar_lea.hbm %s592_s0, 64 }
  0x12   : > { %p414_p1 = scmp.lt.s32.totalorder %s407_s7, %s592_s0  ;;  %p415_p2 = scmp.lt.s32.totalorder %s413_s11, %s408_s8 }
  0x13   : > { %p411_p13 = pnand %p410_p12, %p409_p11 }
  0x14   : > { %p416_p3 = por %p415_p2, %p414_p1 }
  0x15   : > { %p412_p0 = pneg %p411_p13 }
  0x17   : > { %p417_p4 = pnand %p416_p3, %p412_p0 }
  0x19   : > { %420 = shalt.err (!%p417_p4)
}
  0x1a   : > { %370 = dma.hbm_to_vmem [thread:$0]  (!%p543_p8), %s146_s4, 256, %s148_s30, %s135_s6  }
  0x1b   : > { %p153_p5 = pnand %p356_p9, %p152_p10 }
  0x1c   : > { %s158_s19 = sand.u32 (!%p153_p5), 1, %s462_s13  }
  0x1d   : > { %156 = sbr.rel (%p153_p5) target bundleno = 185 (0xb9), region = 32  ;;  %s357_s21 = sshll.u32 (!%p153_p5), %s158_s19, 4 }
  0x1e   : > { %s159_s23 = scalar_lea.sflag (!%p153_p5), [#allocation3], %s158_s19  ;;  %s162_s24 = scalar_lea.vmem (!%p153_p5), [#allocation2], %s357_s21 }
  0x22   : > { %453 = dma.done.wait (%p532_p7), %s159_s23, 256  }
  0x23   : > { %455 = vsyncadd (%p532_p7), %s159_s23, 4294967040  ;;  %v472_v0 = vmov 0   ;;  %v193_v1 = vld [vmem:[%s162_s24] sm:$0xff]  ;;  %v194_v2 = vld [vmem:[%s162_s24 + $0x8] sm:$0xff]  ;;  %vm229_vm0 = vcmask 588800   ;;  %s358_s28 = sshll.u32 %s349_s16, 1 }
  0x24   : > { %405 = vset.pattern.permute.xlu0 %v472_v0  ;;  %240 = vmatpush.msra.mxu0 %v193_v1  ;;  %v223_v3 = vperm.slane %v193_v1, 7  ;;  %v224_v4 = vperm.slane %v194_v2, 7  ;;  %v219_v5 = vperm.slane %v193_v1, 6  ;;  %v220_v6 = vperm.slane %v194_v2, 6  ;;  %v227_v7 = vld [vmem:[%s594_s2] sm:$0xff]  ;;  %p188_p6 = scmp.lt.s32.totalorder %s358_s28, 7 }
  0x25   : > { %260 = vmatpush.msra.mxu1 %v194_v2  ;;  %v215_v8 = vperm.slane %v193_v1, 5  ;;  %v216_v9 = vperm.slane %v194_v2, 5  ;;  %v211_v10 = vperm.slane %v193_v1, 4  ;;  %v212_v11 = vperm.slane %v194_v2, 4  ;;  %275 = vperm.xlu0 %405, %v227_v7   ;;  %v228_v36 = vld [vmem:[%s593_s1] sm:$0xff] }
  0x26   : > { %v225_v12 = vmul.f32 %v223_v3, %v193_v1  ;;  %v226_v13 = vmul.f32 %v224_v4, %v194_v2  ;;  %v221_v14 = vmul.f32 %v219_v5, %v193_v1  ;;  %v222_v15 = vmul.f32 %v220_v6, %v194_v2  ;;  %s604_s28 = smov (!%p188_p6, %s358_s28), 7 }
  0x27   : > { %v217_v16 = vmul.f32 %v215_v8, %v193_v1  ;;  %v218_v17 = vmul.f32 %v216_v9, %v194_v2  ;;  %v207_v18 = vperm.slane %v193_v1, 3  ;;  %v208_v19 = vperm.slane %v194_v2, 3  ;;  %s359_s29 = sshll.u32 %s604_s28, 3 }
  0x28   : > { %241 = vmatpush.msra.mxu0 %v225_v12  ;;  %261 = vmatpush.msra.mxu1 %v226_v13  ;;  %v213_v20 = vmul.f32 %v211_v10, %v193_v1  ;;  %v214_v21 = vmul.f32 %v212_v11, %v194_v2  ;;  %v203_v22 = vperm.slane %v193_v1, 2  ;;  %v204_v23 = vperm.slane %v194_v2, 2  ;;  %s191_s5 = scalar_lea.vmem %s595_s3, %s359_s29 }
  0x29   : > { %v209_v24 = vmul.f32 %v207_v18, %v193_v1  ;;  %v210_v25 = vmul.f32 %v208_v19, %v194_v2  ;;  %v199_v26 = vperm.slane %v193_v1, 1  ;;  %v200_v27 = vperm.slane %v194_v2, 1 }
  0x2a   : > { %242 = vmatpush.msra.mxu0 %v221_v14  ;;  %262 = vmatpush.msra.mxu1 %v222_v15  ;;  %v205_v28 = vmul.f32 %v203_v22, %v193_v1  ;;  %v206_v29 = vmul.f32 %v204_v23, %v194_v2  ;;  %v195_v30 = vperm.slane %v193_v1, 0  ;;  %v196_v31 = vperm.slane %v194_v2, 0 }
  0x2b   : > { %v201_v32 = vmul.f32 %v199_v26, %v193_v1  ;;  %v202_v33 = vmul.f32 %v200_v27, %v194_v2 }
  0x2c   : > { %243 = vmatpush.msra.mxu0 %v217_v16  ;;  %263 = vmatpush.msra.mxu1 %v218_v17  ;;  %v197_v34 = vmul.f32 %v195_v30, %v193_v1  ;;  %v198_v35 = vmul.f32 %v196_v31, %v194_v2 }
  0x2e   : > { %244 = vmatpush.msra.mxu0 %v213_v20  ;;  %264 = vmatpush.msra.mxu1 %v214_v21 }
  0x30   : > { %245 = vmatpush.msra.mxu0 %v209_v24  ;;  %265 = vmatpush.msra.mxu1 %v210_v25 }
  0x32   : > { %246 = vmatpush.msra.mxu0 %v205_v28  ;;  %266 = vmatpush.msra.mxu1 %v206_v29 }
  0x34   : > { %247 = vmatpush.msra.mxu0 %v201_v32  ;;  %267 = vmatpush.msra.mxu1 %v202_v33 }
  0x36   : > { %248 = vmatpush.msra.mxu0 %v197_v34  ;;  %268 = vmatpush.msra.mxu1 %v198_v35 }
  0x37   : > { %360 = vmatmul.msk.f32.vlgmr.msra.gmra.mxu0 %vm229_vm0, %v228_v36  ;;  %361 = vmatmul.msk.f32.vlgmr.msra.gmra.mxu1 %vm229_vm0, %v228_v36 }
  0x97   : > { %v276_v37 = vpop.permute.xlu0 %275 }
  0xb4   : > { %v250_v38 = vpop.f32.mrf.mxu0  ;;  %v270_v39 = vpop.f32.mrf.mxu1 }
  0xb5   : > { %v278_v40 = vadd.f32 %v276_v37, %v250_v38  ;;  %v279_v41 = vadd.f32 %v276_v37, %v270_v39 }
  0xb7   : > { %280 = vst [vmem:[%s191_s5] sm:$0xff] %v278_v40 }
  0xb8   : > { %281 = vst [vmem:[%s191_s5 + $0x8] sm:$0xff] %v279_v41 }
  0xb9 PF: > { %p13_p7 = scmp.ge.s32.totalorder %s513_s17, 6   ;;  %s599_s12 = smov %s462_s13 }
  0xba   : > { %s600_s13 = smov %s466_s14  ;;  %s601_s14 = smov %s523_s20 }
  0xbb   : > { %s602_s15 = smov %s513_s17  ;;  %15 = sbr.rel (!%p13_p7) target bundleno = 3 (0x3), region = 72 }
  0xc0   :  { %304 = vsyncpa [#allocation3], 1 }
  0xc1   :  { %306 = vsyncpa [#allocation3 + $0x1], 1 }

</bundles_post_ra>
